<compile_context>
chip_gen: v7x
topology: tpu7x:2x2x1
jax: 0.10.0
libtpu: 0.0.40
codegen_flags: <defaults>
</compile_context>

<pallas_src>
import functools

import jax
import jax.numpy as jnp
from jax.experimental import pallas as pl
from jax.experimental.pallas import tpu as pltpu

LOG_STD_MAX = 2.0
LOG_STD_MIN = -5.0

_LANE = 128
_SUBLANE = 8


def _round_up(x, m):
    return (x + m - 1) // m * m


def _mlp_kernel(obs_ref, w1_ref, w2_ref, w3_ref, bias_ref, mean_ref, *, hp, act_dim):
    """One batch tile of the 3-layer MLP. bias_ref rows: 0->b1, 1->b2, 2->b3."""
    bias = bias_ref[...]                       # (8, wmax) f32, zero-padded
    b1 = bias[0:1, :hp]
    b2 = bias[1:2, :hp]
    b3 = bias[2:3, :act_dim]

    # Layer 1: MXU matmul (f32 accumulate) + bias + ReLU in f32 (VPU).
    h1 = jnp.dot(obs_ref[...], w1_ref[...], preferred_element_type=jnp.float32)
    h1 = jnp.maximum(h1 + b1, 0.0)

    # Layer 2.
    h2 = jnp.dot(h1.astype(w2_ref.dtype), w2_ref[...],
                 preferred_element_type=jnp.float32)
    h2 = jnp.maximum(h2 + b2, 0.0)

    # Output layer: Gaussian mean, written directly at (tb, act_dim).
    mean = jnp.dot(h2.astype(w3_ref.dtype), w3_ref[...],
                   preferred_element_type=jnp.float32)
    mean_ref[...] = (mean + b3).astype(mean_ref.dtype)


def prepare_params(params, compute_dtype=jnp.bfloat16):
    """One-time (parameter-load-time) padding / packing of the policy weights.

    Hoisted out of the per-call forward so XLA does not re-materialize the
    padded copies every env step.
    """
    w1, b1, w2, b2, w3, b3, log_std = params
    obs_dim, hidden = w1.shape
    act_dim = w3.shape[1]

    hp = _round_up(hidden, _LANE)      # lane-dense hidden dim for the matmuls
    wmax = max(hp, act_dim)
    cd = compute_dtype

    # Weights: pad only the hidden dims; obs_dim and act_dim stay un-padded.
    w1_p = jnp.zeros((obs_dim, hp), cd).at[:, :hidden].set(w1.astype(cd))
    w2_p = jnp.zeros((hp, hp), cd).at[:hidden, :hidden].set(w2.astype(cd))
    w3_p = jnp.zeros((hp, act_dim), cd).at[:hidden, :].set(w3.astype(cd))

    # Pack the three bias rows into one small f32 input (rows padded to 8).
    bias_p = jnp.zeros((_SUBLANE, wmax), jnp.float32)
    bias_p = bias_p.at[0, :hidden].set(b1.astype(jnp.float32))
    bias_p = bias_p.at[1, :hidden].set(b2.astype(jnp.float32))
    bias_p = bias_p.at[2, :act_dim].set(b3.astype(jnp.float32))

    # Batch-independent scale_tril: computed once here, not per forward call.
    std = jnp.exp(jnp.clip(log_std.astype(jnp.float32), LOG_STD_MIN, LOG_STD_MAX))
    scale_tril = jnp.diag(std)

    return dict(
        w1=w1_p, w2=w2_p, w3=w3_p, bias=bias_p, scale_tril=scale_tril,
        obs_dim=obs_dim, hidden=hidden, act_dim=act_dim, hp=hp, wmax=wmax,
        compute_dtype=cd,
    )


def gaussian_policy_forward(obs, prep, *, tile_b=512):
    """Returns (mean, scale_tril) parameterizing the MultivariateNormal."""
    cd = prep["compute_dtype"]
    obs_dim, act_dim = prep["obs_dim"], prep["act_dim"]
    hp, wmax = prep["hp"], prep["wmax"]

    B = obs.shape[0]
    assert obs.shape[1] == obs_dim

    # Batch tile: multiple of 8 (sublane), capped at tile_b / padded B.
    tb = max(_SUBLANE, min(_round_up(tile_b, _SUBLANE), _round_up(B, _SUBLANE)))
    bp = _round_up(B, tb)
    n_tiles = bp // tb
    # v7x megacore: prefer >= 2 batch tiles so the "parallel" axis shards across
    # both TensorCores (neutral on single-TC v5e / v6e).
    if n_tiles < 2 and tb > _SUBLANE:
        tb = max(_SUBLANE, _round_up((B + 1) // 2, _SUBLANE))
        bp = _round_up(B, tb)
        n_tiles = bp // tb

    # Stream obs as bf16 (or f32); pad rows only when B is not a tile multiple.
    obs_c = obs.astype(cd)
    if bp != B:
        obs_c = jnp.zeros((bp, obs_dim), cd).at[:B].set(obs_c)

    kernel = functools.partial(_mlp_kernel, hp=hp, act_dim=act_dim)

    mean_p = pl.pallas_call(
        kernel,
        grid=(n_tiles,),
        in_specs=[
            pl.BlockSpec((tb, obs_dim), lambda i: (i, 0)),        # obs: batch-tiled, un-padded lanes
            pl.BlockSpec((obs_dim, hp), lambda i: (0, 0)),        # W1: VMEM-resident
            pl.BlockSpec((hp, hp), lambda i: (0, 0)),             # W2: VMEM-resident
            pl.BlockSpec((hp, act_dim), lambda i: (0, 0)),        # W3: VMEM-resident
            pl.BlockSpec((_SUBLANE, wmax), lambda i: (0, 0)),     # packed biases
        ],
        out_specs=pl.BlockSpec((tb, act_dim), lambda i: (i, 0)),  # mean: batch-tiled, un-padded lanes
        out_shape=jax.ShapeDtypeStruct((bp, act_dim), jnp.float32),
        compiler_params=pltpu.CompilerParams(
            dimension_semantics=("parallel",),
        ),
    )(obs_c, prep["w1"], prep["w2"], prep["w3"], prep["bias"])

    mean = mean_p if bp == B else mean_p[:B]
    return mean, prep["scale_tril"]


def init_params(key, obs_dim, act_dim, hidden_dim):
    """Deterministic init matching the shapes of the PyTorch module."""
    ks = jax.random.split(key, 6)

    def linear(kw, kb, fan_in, fan_out):
        bound = 1.0 / jnp.sqrt(fan_in)
        w = jax.random.uniform(kw, (fan_in, fan_out), jnp.float32, -bound, bound)
        b = jax.random.uniform(kb, (fan_out,), jnp.float32, -bound, bound)
        return w, b

    w1, b1 = linear(ks[0], ks[1], obs_dim, hidden_dim)
    w2, b2 = linear(ks[2], ks[3], hidden_dim, hidden_dim)
    w3, b3 = linear(ks[4], ks[5], hidden_dim, act_dim)
    log_std = jnp.zeros((act_dim,), jnp.float32)  # nn.Parameter(torch.zeros(act_dim))
    return (w1, b1, w2, b2, w3, b3, log_std)


def reference_forward(obs, params):
    w1, b1, w2, b2, w3, b3, log_std = params
    h1 = jnp.maximum(obs @ w1 + b1, 0.0)
    h2 = jnp.maximum(h1 @ w2 + b2, 0.0)
    mean = h2 @ w3 + b3
    std = jnp.exp(jnp.clip(log_std, LOG_STD_MIN, LOG_STD_MAX))
    return mean, jnp.diag(std)


if __name__ == "__main__":
    key = jax.random.PRNGKey(0)
    k_param, k_obs = jax.random.split(key)

    batch, obs_dim, act_dim, hidden_dim = 8, 16, 8, 32
    params = init_params(k_param, obs_dim, act_dim, hidden_dim)
    obs = jax.random.normal(k_obs, (batch, obs_dim), jnp.float32)

    mean_ref, tril_ref = reference_forward(obs, params)

    # Default (serving) path: bf16 streaming, f32 accumulate -> loose tolerance.
    prep_bf16 = prepare_params(params, compute_dtype=jnp.bfloat16)
    mean_bf16, tril_bf16 = gaussian_policy_forward(obs, prep_bf16)
    jax.block_until_ready((mean_bf16, tril_bf16))
    assert jnp.allclose(mean_bf16, mean_ref, atol=5e-2, rtol=5e-2)
    assert jnp.allclose(tril_bf16, tril_ref, atol=1e-6, rtol=1e-6)

    # Exactness path: full f32 -> tight tolerance against the reference.
    prep_f32 = prepare_params(params, compute_dtype=jnp.float32)
    mean_f32, tril_f32 = gaussian_policy_forward(obs, prep_f32)
    jax.block_until_ready((mean_f32, tril_f32))
    assert jnp.allclose(mean_f32, mean_ref, atol=1e-4, rtol=1e-4)
    assert jnp.allclose(tril_f32, tril_ref, atol=1e-6, rtol=1e-6)

    # TODO(synk): MultivariateNormal sampling (dist.sample / .act) is not a
    # Pallas op here; only the distribution parameters are produced in-kernel.
    print("KERNEL_OK")
</pallas_src>

<mosaic_0001>
module attributes {stable_mosaic.version = 11 : i64} {
  func.func @_mlp_kernel(%arg0: i32, %arg1: memref<8x16xbf16, #tpu.memory_space<vmem>>, %arg2: memref<16x128xbf16, #tpu.memory_space<vmem>>, %arg3: memref<128x128xbf16, #tpu.memory_space<vmem>>, %arg4: memref<128x8xbf16, #tpu.memory_space<vmem>>, %arg5: memref<8x128xf32, #tpu.memory_space<vmem>>, %arg6: memref<8x8xf32, #tpu.memory_space<vmem>>) attributes {dimension_semantics = [#tpu.dimension_semantics<parallel>], iteration_bounds = array<i64: 1>, scalar_prefetch = 0 : i64, scratch_operands = 0 : i64, tpu.core_type = #tpu.core_type<tc>, window_params = [{transform_indices = @transform_0, window_bounds = array<i64: 8, 16>}, {pipeline_mode = #tpu.pipeline_mode<synchronous>, transform_indices = @transform_1, window_bounds = array<i64: 16, 128>}, {pipeline_mode = #tpu.pipeline_mode<synchronous>, transform_indices = @transform_2, window_bounds = array<i64: 128, 128>}, {pipeline_mode = #tpu.pipeline_mode<synchronous>, transform_indices = @transform_3, window_bounds = array<i64: 128, 8>}, {pipeline_mode = #tpu.pipeline_mode<synchronous>, transform_indices = @transform_4, window_bounds = array<i64: 8, 128>}, {transform_indices = @transform_5, window_bounds = array<i64: 8, 8>}]} {
    %c0 = arith.constant 0 : index
    %c0_0 = arith.constant 0 : index
    %0 = vector.load %arg5[%c0, %c0_0] : memref<8x128xf32, #tpu.memory_space<vmem>>, vector<8x128xf32>
    %1 = vector.extract_strided_slice %0 {offsets = [0, 0], sizes = [1, 128], strides = [1, 1]} : vector<8x128xf32> to vector<1x128xf32>
    %2 = vector.extract_strided_slice %0 {offsets = [1, 0], sizes = [1, 128], strides = [1, 1]} : vector<8x128xf32> to vector<1x128xf32>
    %3 = vector.extract_strided_slice %0 {offsets = [2, 0], sizes = [1, 8], strides = [1, 1]} : vector<8x128xf32> to vector<1x8xf32>
    %c0_1 = arith.constant 0 : index
    %c0_2 = arith.constant 0 : index
    %4 = vector.load %arg1[%c0_1, %c0_2] : memref<8x16xbf16, #tpu.memory_space<vmem>>, vector<8x16xbf16>
    %c0_3 = arith.constant 0 : index
    %c0_4 = arith.constant 0 : index
    %5 = vector.load %arg2[%c0_3, %c0_4] : memref<16x128xbf16, #tpu.memory_space<vmem>>, vector<16x128xbf16>
    %cst = arith.constant dense<0.000000e+00> : vector<8x128xf32>
    %6 = tpu.matmul %4, %5, %cst {dimension_numbers = #tpu.dot_dimension_numbers<[1], [0], [0], [1], [0, 0, 1, 1], [], []>} : vector<8x16xbf16>, vector<16x128xbf16>, vector<8x128xf32> -> vector<8x128xf32>
    %7 = vector.broadcast %1 : vector<1x128xf32> to vector<8x128xf32>
    %8 = arith.addf %6, %7 : vector<8x128xf32>
    %cst_5 = arith.constant 0.000000e+00 : f32
    %9 = vector.broadcast %cst_5 : f32 to vector<8x128xf32>
    %10 = arith.maximumf %8, %9 : vector<8x128xf32>
    %11 = arith.truncf %10 : vector<8x128xf32> to vector<8x128xbf16>
    %c0_6 = arith.constant 0 : index
    %c0_7 = arith.constant 0 : index
    %12 = vector.load %arg3[%c0_6, %c0_7] : memref<128x128xbf16, #tpu.memory_space<vmem>>, vector<128x128xbf16>
    %cst_8 = arith.constant dense<0.000000e+00> : vector<8x128xf32>
    %13 = tpu.matmul %11, %12, %cst_8 {dimension_numbers = #tpu.dot_dimension_numbers<[1], [0], [0], [1], [0, 0, 1, 1], [], []>} : vector<8x128xbf16>, vector<128x128xbf16>, vector<8x128xf32> -> vector<8x128xf32>
    %14 = vector.broadcast %2 : vector<1x128xf32> to vector<8x128xf32>
    %15 = arith.addf %13, %14 : vector<8x128xf32>
    %cst_9 = arith.constant 0.000000e+00 : f32
    %16 = vector.broadcast %cst_9 : f32 to vector<8x128xf32>
    %17 = arith.maximumf %15, %16 : vector<8x128xf32>
    %18 = arith.truncf %17 : vector<8x128xf32> to vector<8x128xbf16>
    %c0_10 = arith.constant 0 : index
    %c0_11 = arith.constant 0 : index
    %19 = vector.load %arg4[%c0_10, %c0_11] : memref<128x8xbf16, #tpu.memory_space<vmem>>, vector<128x8xbf16>
    %cst_12 = arith.constant dense<0.000000e+00> : vector<8x8xf32>
    %20 = tpu.matmul %18, %19, %cst_12 {dimension_numbers = #tpu.dot_dimension_numbers<[1], [0], [0], [1], [0, 0, 1, 1], [], []>} : vector<8x128xbf16>, vector<128x8xbf16>, vector<8x8xf32> -> vector<8x8xf32>
    %21 = vector.broadcast %3 : vector<1x8xf32> to vector<8x8xf32>
    %22 = arith.addf %20, %21 : vector<8x8xf32>
    %c0_13 = arith.constant 0 : index
    %c0_14 = arith.constant 0 : index
    %23 = vector.load %arg6[%c0_13, %c0_14] : memref<8x8xf32, #tpu.memory_space<vmem>>, vector<8x8xf32>
    tpu.vector_store %arg6[%c0_13, %c0_14], %22 {strides = array<i32>} : memref<8x8xf32, #tpu.memory_space<vmem>>, vector<8x8xf32>,
    return
  }
  func.func @transform_0(%arg0: i32) -> (i32, i32) {
    %c0_i32 = arith.constant 0 : i32
    %c0_i32_0 = arith.constant 0 : i32
    return %arg0, %c0_i32 : i32, i32
  }
  func.func @transform_1(%arg0: i32) -> (i32, i32) {
    %c0_i32 = arith.constant 0 : i32
    %c0_i32_0 = arith.constant 0 : i32
    %c0_i32_1 = arith.constant 0 : i32
    return %c0_i32, %c0_i32_0 : i32, i32
  }
  func.func @transform_2(%arg0: i32) -> (i32, i32) {
    %c0_i32 = arith.constant 0 : i32
    %c0_i32_0 = arith.constant 0 : i32
    %c0_i32_1 = arith.constant 0 : i32
    return %c0_i32, %c0_i32_0 : i32, i32
  }
  func.func @transform_3(%arg0: i32) -> (i32, i32) {
    %c0_i32 = arith.constant 0 : i32
    %c0_i32_0 = arith.constant 0 : i32
    %c0_i32_1 = arith.constant 0 : i32
    return %c0_i32, %c0_i32_0 : i32, i32
  }
  func.func @transform_4(%arg0: i32) -> (i32, i32) {
    %c0_i32 = arith.constant 0 : i32
    %c0_i32_0 = arith.constant 0 : i32
    %c0_i32_1 = arith.constant 0 : i32
    return %c0_i32, %c0_i32_0 : i32, i32
  }
  func.func @transform_5(%arg0: i32) -> (i32, i32) {
    %c0_i32 = arith.constant 0 : i32
    %c0_i32_0 = arith.constant 0 : i32
    return %arg0, %c0_i32 : i32, i32
  }
}

</mosaic_0001>

<bundles_post_ra>
// kernel: tpu_custom_call.1
= control target key start
LH: loop header
LB: loop body
LE: loop exit
PB: predicated region body
PF: predicated region fallthrough
CT: control target
= control target key end

     0   :  { %10 = vsyncpa [#allocation3], 0  ;;  %s614_s0 = inlined_call_operand.hbm [shape: bf16[8,16], index: 0, kind: input, shape index: {}]   ;;  %s615_s1 = inlined_call_operand.vmem [shape: bf16[16,128], index: 1, kind: input, shape index: {}]   ;;  %s616_s2 = inlined_call_operand.vmem [shape: bf16[128,128], index: 2, kind: input, shape index: {}]   ;;  %s617_s3 = inlined_call_operand.vmem [shape: bf16[128,8], index: 3, kind: input, shape index: {}]   ;;  %s618_s4 = inlined_call_operand.vmem [shape: f32[8,128], index: 4, kind: input, shape index: {}]   ;;  %s619_s5 = inlined_call_operand.hbm [shape: f32[8,8], index: 5, kind: output, shape index: {}]  }
   0x1   :  { %11 = vsyncpa [#allocation4], 0  ;;  %s482_s18 = smov [#allocation2]   ;;  %s434_s22 = scalar_lea.hbm %s614_s0, 64 }
   0x2   :  { %s18_s19 = sshll.u32 %s482_s18, 4  ;;  %p435_p0 = scmp.ne.s32.totalorder %s614_s0, %s434_s22  ;;  %s19_s19 = int_to_ptr.vmem [resolvable:$true] %s18_s19 }
   0x3   :  { %p438_p1 = scmp.lt.u32.totalorder %s434_s22, %s614_s0 }
   0x5   :  { %p440_p2 = pnand %p438_p1, %p435_p0 }
   0x7   :  { %443 = shalt.err (!%p440_p2)
}
   0x8   :  { %s444_s27 = scalar_lea.vmem %s19_s19, 64  ;;  %p449_p4 = scmp.lt.s32.totalorder %s19_s19, %s19_s19 }
   0x9   :  { %p445_p3 = scmp.ne.s32.totalorder %s19_s19, %s444_s27  ;;  %p450_p5 = scmp.lt.s32.totalorder %s444_s27, %s444_s27 }
   0xb   :  { %p451_p6 = por %p450_p5, %p449_p4 }
   0xd   :  { %p452_p7 = pnand %p451_p6, %p445_p3 }
   0xf   :  { %455 = shalt.err (!%p452_p7)
}
  0x10   :  { %21 = dma.hbm_to_vmem [thread:$0]  %s614_s0, 64, %s19_s19, [#allocation3]  }
  0x11   :  { %478 = dma.done.wait [#allocation3], 64  }
  0x12   :  { %479 = vsyncadd [#allocation3], 4294967232  ;;  %v483_v0 = vmov 0.0   ;;  %vm484_vm0 = vmmov 0   ;;  %v417_v1 = vld [vmem:[%s615_s1] sm:$0xff]   ;;  %vm48_vm1 = vcmask 130048   ;;  %v38_v17 = vlaneseq }
  0x13   :  { %367 = vmatprep.subr.bf16.mxu0 %v483_v0  ;;  %369 = vmatprep.mubr.msk.bf16.mxu0 %vm484_vm0, %v483_v0  ;;  %v35_v2 = vld [vmem:[#allocation2] sm:$0xf]  ;;  %v419_v4 = vld [vmem:[%s616_s2 + $0x8] sm:$0xff]   ;;  %v420_v5 = vld [vmem:[%s616_s2 + $0x10] sm:$0xff]   ;;  %vm312_vm2 = vcmask 64512  }
  0x14   :  { %373 = vmatprep.subr.bf16.mxu1 %v483_v0  ;;  %389 = vmatprep.mubr.msk.bf16.mxu1 %vm484_vm0, %v483_v0  ;;  %v418_v3 = vld [vmem:[%s616_s2] sm:$0xff]   ;;  %v421_v6 = vld [vmem:[%s616_s2 + $0x18] sm:$0xff]   ;;  %v423_v8 = vld [vmem:[%s616_s2 + $0x28] sm:$0xff]   ;;  %v39_v18 = vshrl.u32 %v38_v17, 7 }
  0x15   :  { %368 = vmatpush3.bf16.msra.mxu0 %v417_v1  ;;  %374 = vmatpush3.bf16.msra.mxu1 %v418_v3  ;;  %v422_v7 = vld [vmem:[%s616_s2 + $0x20] sm:$0xff]   ;;  %v424_v9 = vld [vmem:[%s616_s2 + $0x30] sm:$0xff]   ;;  %v425_v10 = vld [vmem:[%s616_s2 + $0x38] sm:$0xff]  }
  0x16   :  { %393 = vmatprep.subr.bf16.mxu0 %v483_v0  ;;  %375 = vmatprep.subr.bf16.mxu1 %v483_v0  ;;  %v426_v11 = vld [vmem:[%s617_s3] sm:$0xff]   ;;  %v427_v12 = vld [vmem:[%s617_s3 + $0x8] sm:$0xff]   ;;  %v428_v13 = vld [vmem:[%s617_s3 + $0x10] sm:$0xff]   ;;  %v40_v19 = vsub.s32 0, %v39_v18  ;;  %v112_v31 = vsub.s32 1, %v39_v18  ;;  %v222_v40 = vsub.s32 2, %v39_v18 }
  0x17   :  { %v429_v14 = vld [vmem:[%s617_s3 + $0x18] sm:$0xff]   ;;  %v430_v15 = vld [vmem:[%s617_s3 + $0x20] sm:$0xff]   ;;  %v431_v16 = vld [vmem:[%s617_s3 + $0x28] sm:$0xff]  }
  0x18   :  { %370 = vmatmul.mubr.msk.bf16.vlgmr.msra.gmra.mrb[0].mxu0 %vm48_vm1, %v35_v2  ;;  %v34_v20 = vld [vmem:[%s618_s4] sm:$0xff]  ;;  %v432_v29 = vld [vmem:[%s617_s3 + $0x30] sm:$0xff]   ;;  %v433_v30 = vld [vmem:[%s617_s3 + $0x38] sm:$0xff]   ;;  %s485_s4 = smov [#allocation5]  }
  0x19   :  { %409 = vmatprep.mubr.msk.bf16.mxu0 %vm484_vm0, %v483_v0  ;;  %376 = vmatpush3.bf16.msra.mxu1 %v419_v4  ;;  %v41_v21 = vrot.slane %v34_v20, %v40_v19  ;;  %v113_v32 = vrot.slane %v34_v20, %v112_v31  ;;  %v223_v41 = vrot.slane %v34_v20, %v222_v40  ;;  %s320_s11 = sshll.u32 %s485_s4, 4  ;;  %s321_s11 = int_to_ptr.vmem [resolvable:$true] %s320_s11 }
  0x1a   :  { %377 = vmatprep.subr.bf16.mxu1 %v483_v0  ;;  %394 = vmatpush3.bf16.msra.mxu0 %v426_v11  ;;  %s456_s3 = scalar_lea.vmem %s321_s11, 128  ;;  %p461_p9 = scmp.lt.s32.totalorder %s321_s11, %s321_s11 }
  0x1b   :  { %395 = vmatprep.subr.bf16.mxu0 %v483_v0  ;;  %p457_p8 = scmp.ne.s32.totalorder %s321_s11, %s456_s3  ;;  %p462_p10 = scmp.lt.s32.totalorder %s456_s3, %s456_s3 }
  0x1d   :  { %378 = vmatpush3.bf16.msra.mxu1 %v420_v5  ;;  %p463_p11 = por %p462_p10, %p461_p9 }
  0x1e   :  { %379 = vmatprep.subr.bf16.mxu1 %v483_v0  ;;  %396 = vmatpush3.bf16.msra.mxu0 %v427_v12 }
  0x1f   :  { %397 = vmatprep.subr.bf16.mxu0 %v483_v0  ;;  %p464_p12 = pnand %p463_p11, %p457_p8 }
  0x21   :  { %380 = vmatpush3.bf16.msra.mxu1 %v421_v6 }
  0x22   :  { %381 = vmatprep.subr.bf16.mxu1 %v483_v0  ;;  %398 = vmatpush3.bf16.msra.mxu0 %v428_v13 }
  0x23   :  { %399 = vmatprep.subr.bf16.mxu0 %v483_v0 }
  0x25   :  { %382 = vmatpush3.bf16.msra.mxu1 %v422_v7 }
  0x26   :  { %383 = vmatprep.subr.bf16.mxu1 %v483_v0  ;;  %400 = vmatpush3.bf16.msra.mxu0 %v429_v14 }
  0x27   :  { %401 = vmatprep.subr.bf16.mxu0 %v483_v0 }
  0x29   :  { %384 = vmatpush3.bf16.msra.mxu1 %v423_v8 }
  0x2a   :  { %385 = vmatprep.subr.bf16.mxu1 %v483_v0  ;;  %402 = vmatpush3.bf16.msra.mxu0 %v430_v15 }
  0x2b   :  { %403 = vmatprep.subr.bf16.mxu0 %v483_v0 }
  0x2d   :  { %386 = vmatpush3.bf16.msra.mxu1 %v424_v9 }
  0x2e   :  { %387 = vmatprep.subr.bf16.mxu1 %v483_v0  ;;  %404 = vmatpush3.bf16.msra.mxu0 %v431_v16 }
  0x2f   :  { %405 = vmatprep.subr.bf16.mxu0 %v483_v0 }
  0x31   :  { %388 = vmatpush3.bf16.msra.mxu1 %v425_v10 }
  0x32   :  { %406 = vmatpush3.bf16.msra.mxu0 %v432_v29 }
  0x33   :  { %407 = vmatprep.subr.bf16.mxu0 %v483_v0 }
  0x36   :  { %408 = vmatpush3.bf16.msra.mxu0 %v433_v30 }
  0xeb   :  { %v86_v22 = vpop.f32.mrb[0].mxu0 }
  0xec   :  { %v87_v23 = vadd.f32 %v86_v22, %v41_v21  ;;  %v371_v24 = vpop.f32.mrb[1].mxu0 }
  0xed   :  { %v89_v25 = vpop.f32.mrb[2].mxu0 }
  0xee   :  { %v92_v26 = vmax.f32 %v87_v23, 0.0  ;;  %v372_v27 = vpop.f32.mrb[3].mxu0 }
  0xf0   :  { %v93_v28 = vpack.c.bf16 %v92_v26, %v92_v26 }
  0xf2   :  { %390 = vmatmul.mubr.bf16.vlgmr.msra.gmra.mrb[0].mxu1 %v93_v28 }
 0x1c5   :  { %v196_v33 = vpop.f32.mrb[0].mxu1 }
 0x1c6   :  { %v197_v34 = vadd.f32 %v196_v33, %v113_v32  ;;  %v391_v35 = vpop.f32.mrb[1].mxu1 }
 0x1c7   :  { %v199_v36 = vpop.f32.mrb[2].mxu1 }
 0x1c8   :  { %v202_v37 = vmax.f32 %v197_v34, 0.0  ;;  %v392_v38 = vpop.f32.mrb[3].mxu1 }
 0x1ca   :  { %v203_v39 = vpack.c.bf16 %v202_v37, %v202_v37 }
 0x1cc   :  { %410 = vmatmul.mubr.bf16.vlgmr.msra.gmra.mrb[4].mxu0 %v203_v39 }
 0x29f   :  { %v306_v42 = vpop.f32.mrb[4].mxu0 }
 0x2a0   :  { %v307_v43 = vadd.f32 %v306_v42, %v223_v41  ;;  %v411_v44 = vpop.f32.mrb[5].mxu0 }
 0x2a1   :  { %v309_v45 = vpop.f32.mrb[6].mxu0 }
 0x2a2   :  { %v412_v46 = vpop.f32.mrb[7].mxu0  ;;  %313 = vst.msk [vmem:[#allocation5] sm:$0xff] %vm312_vm2, %v307_v43 }
 0x2a3   :  { %467 = shalt.err (!%p464_p12)
}
 0x2a4   :  { %s468_s14 = scalar_lea.hbm %s619_s5, 128 }
 0x2a5   :  { %p469_p13 = scmp.ne.s32.totalorder %s619_s5, %s468_s14  ;;  %p472_p0 = scmp.lt.u32.totalorder %s468_s14, %s619_s5 }
 0x2a7   :  { %p474_p1 = pnand %p472_p0, %p469_p13 }
 0x2a9   :  { %477 = shalt.err (!%p474_p1)
}
 0x2aa   :  { %323 = dma.vmem_to_hbm [thread:$0]  %s321_s11, 128, %s619_s5, [#allocation4]  }
 0x2ab   :  { %480 = dma.done.wait [#allocation4], 128  }
 0x2ac   :  { %481 = vsyncadd [#allocation4], 4294967168 }
 0x2ad   :  { %327 = vsyncpa [#allocation3], 1 }
 0x2ae   :  { %328 = vsyncpa [#allocation4], 1 }

</bundles_post_ra>
